<compile_context>
chip_gen: v7x
topology: tpu7x:2x2x1
jax: 0.10.0
libtpu: 0.0.40
codegen_flags: <defaults>
</compile_context>

<pallas_src>
import functools

import jax
import jax.numpy as jnp
from jax import lax
from jax.experimental import pallas as pl
from jax.experimental.pallas import tpu as pltpu


# ------------------------------ Pallas kernel -------------------------------

def _fused_irb_kernel(xph_ref, mask_ref, w1_ref, b1_ref, wdw_ref, b2_ref,
                      w3t_ref, b3_ref, *rest,
                      stride, ksize, Hq, Wq, Lout, res_mode):
    """Whole inverted-residual block for one image (grid step = one batch elem).

    Channel-major layout: channels on sublanes, flattened (phase, Hq, Wq)
    padded spatial extent on lanes.

    xph_ref : (Cin,  Lfull)  phase-decomposed, zero-padded input
    mask_ref: (1,    Lfull)  1.0 on real pixels, 0.0 on padding
    eph_ref : (Cmid, Lfull)  VMEM scratch for the expanded activation
    out_ref : (Cout, Lout)   lane-dense (Lout = Hout*Wq, multiple of 128)
    """
    if res_mode == 'conv':
        wrt_ref, br_ref, xres_ref, out_ref, eph_ref = rest
    elif res_mode == 'identity':
        xres_ref, out_ref, eph_ref = rest
    else:
        out_ref, eph_ref = rest

    s = stride
    cmid = w1_ref.shape[0]
    Lfull = eph_ref.shape[1]

    # ---- 1) expand 1x1 conv (BN scale pre-folded into w1): ONE matmul over the
    #      whole phase slab, then one bias/ReLU6/mask stream into VMEM scratch.
    #      Padding positions are zeroed so the depthwise sees true zero padding.
    e = jnp.dot(w1_ref[...], xph_ref[...], preferred_element_type=jnp.float32)
    eph_ref[...] = jnp.clip(e + b1_ref[...], 0.0, 6.0) * mask_ref[...]

    # ---- 2) depthwise KxK conv (stride s): each tap is a static lane rotation
    #      (XLU slot) of the expanded slab followed by a per-channel FMA (VPU).
    acc = jnp.zeros((cmid, Lout), jnp.float32)
    for kh in range(ksize):
        for kw in range(ksize):
            t = kh * ksize + kw
            p = (kh % s) * s + (kw % s)
            off = p * Hq * Wq + (kh // s) * Wq + (kw // s)
            src = eph_ref[...]          # reload per tap keeps live ranges small
            if off:
                # gather-from(i + off): np.roll semantics with shift = L - off
                src = pltpu.roll(src, shift=Lfull - off, axis=1)
            acc = acc + src[:, :Lout] * wdw_ref[:, t:t + 1]
    h = jnp.clip(acc + b2_ref[...], 0.0, 6.0)

    # ---- 3) project 1x1 conv: (Cout, Cmid) @ (Cmid, Lout) -> lane-dense result.
    y = jnp.dot(w3t_ref[...], h, preferred_element_type=jnp.float32)
    y = y + b3_ref[...]

    # ---- 4) residual branch, fused (stride == 1 only).
    if res_mode == 'identity':
        y = y + xres_ref[...].astype(jnp.float32)
    elif res_mode == 'conv':
        y = (y + jnp.dot(wrt_ref[...], xres_ref[...].astype(jnp.float32),
                         preferred_element_type=jnp.float32) + br_ref[...])

    out_ref[...] = y.astype(out_ref.dtype)


# -------------------------------- wrapper ------------------------------------

def _round_wq(wq_min, hout):
    """Smallest Wq >= wq_min with Hout*Wq a multiple of 128 (unmasked, lane-dense
    stores), unless that over-pads badly; then fall back to a multiple of 8."""
    for wq in range(wq_min, wq_min + 129):
        if (hout * wq) % 128 == 0 and wq <= 4 * wq_min:
            return wq
    return -(-wq_min // 8) * 8


def _phase_flatten(x_nchw, stride, ksize):
    """Zero-pad (pad=1) and space-to-depth the input, flattened channel-major:
    (N, C, Lfull) with flat index ((ph*s+pw)*Hq + hq)*Wq + wq, plus the matching
    real-pixel mask.  Cheap: operates on the small un-expanded input."""
    Nb, C, H, W = x_nchw.shape
    s = stride
    Hout = (H + 2 - ksize) // s + 1
    Wout = (W + 2 - ksize) // s + 1
    Hq = -(-(H + 2) // s)
    Wq = _round_wq(-(-(W + 2) // s), Hout)
    L = s * s * Hq * Wq
    Lfull = -(-L // 128) * 128                      # lane-align the full slab

    xpad = jnp.pad(x_nchw,
                   ((0, 0), (0, 0), (1, Hq * s - H - 1), (1, Wq * s - W - 1)))
    xph = xpad.reshape(Nb, C, Hq, s, Wq, s).transpose(0, 1, 3, 5, 2, 4)
    xph = jnp.pad(xph.reshape(Nb, C, L), ((0, 0), (0, 0), (0, Lfull - L)))

    hp = jnp.arange(s)[:, None] + s * jnp.arange(Hq)[None, :]     # (s, Hq)
    wp = jnp.arange(s)[:, None] + s * jnp.arange(Wq)[None, :]     # (s, Wq)
    mh = ((hp >= 1) & (hp <= H)).astype(x_nchw.dtype)
    mw = ((wp >= 1) & (wp <= W)).astype(x_nchw.dtype)
    mask = (mh[:, None, :, None] * mw[None, :, None, :]).reshape(1, L)
    mask = jnp.pad(mask, ((0, 0), (0, Lfull - L)))
    return xph, mask, Hq, Wq, Hout, Wout, Lfull


def inverted_residual_block(x_nchw, p, *, stride, ksize=3):
    """Forward pass matching the PyTorch InvertedResidualBlock (eval-mode BN)."""
    assert stride in (1, 2)
    Nb, Cin, H, W = x_nchw.shape
    cmid = p['w1'].shape[0]
    cout = p['w3'].shape[0]
    s = stride

    xph, mask, Hq, Wq, Hout, Wout, Lfull = _phase_flatten(x_nchw, s, ksize)
    Lout = Hout * Wq

    # Fold BN scale into the conv weights once (tiny wrapper-side op); only the
    # per-channel shift-add stays in-kernel.
    w1 = p['w1'][:, :, 0, 0] * p['s1'][:, None]                    # (Cmid, Cin)
    b1 = p['b1'].reshape(cmid, 1)
    wdw = p['w_dw'][:, 0].reshape(cmid, ksize * ksize) * p['s2'][:, None]
    b2 = p['b2'].reshape(cmid, 1)
    w3t = p['w3'][:, :, 0, 0] * p['s3'][:, None]                   # (Cout, Cmid)
    b3 = p['b3'].reshape(cout, 1)

    res_mode = 'none'
    if s == 1:
        res_mode = 'conv' if Cin != cout else 'identity'

    args = [xph, mask, w1, b1, wdw, b2, w3t, b3]
    in_specs = [
        pl.BlockSpec((None, Cin, Lfull), lambda n: (n, 0, 0)),
        pl.BlockSpec((1, Lfull), lambda n: (0, 0)),
        pl.BlockSpec((cmid, Cin), lambda n: (0, 0)),
        pl.BlockSpec((cmid, 1), lambda n: (0, 0)),
        pl.BlockSpec((cmid, ksize * ksize), lambda n: (0, 0)),
        pl.BlockSpec((cmid, 1), lambda n: (0, 0)),
        pl.BlockSpec((cout, cmid), lambda n: (0, 0)),
        pl.BlockSpec((cout, 1), lambda n: (0, 0)),
    ]
    if res_mode != 'none':
        if res_mode == 'conv':
            wrt = p['wr'][:, :, 0, 0] * p['sr'][:, None]           # (Cout, Cin)
            br = p['br'].reshape(cout, 1)
            args += [wrt, br]
            in_specs += [pl.BlockSpec((cout, Cin), lambda n: (0, 0)),
                         pl.BlockSpec((cout, 1), lambda n: (0, 0))]
        # Residual input in the same channel-major, Wq-padded lane layout as the
        # output (stride==1 -> Hout==H, Wout==W): no in-kernel relayout copy.
        xres = jnp.pad(x_nchw, ((0, 0), (0, 0), (0, 0), (0, Wq - W)))
        xres = xres.reshape(Nb, Cin, Lout)
        args += [xres]
        in_specs += [pl.BlockSpec((None, Cin, Lout), lambda n: (n, 0, 0))]

    kernel = functools.partial(
        _fused_irb_kernel, stride=s, ksize=ksize, Hq=Hq, Wq=Wq, Lout=Lout,
        res_mode=res_mode)

    out = pl.pallas_call(
        kernel,
        out_shape=jax.ShapeDtypeStruct((Nb, cout, Lout), x_nchw.dtype),
        grid_spec=pltpu.PrefetchScalarGridSpec(
            num_scalar_prefetch=0,
            grid=(Nb,),
            in_specs=in_specs,
            out_specs=pl.BlockSpec((None, cout, Lout), lambda n: (n, 0, 0)),
            scratch_shapes=[pltpu.VMEM((cmid, Lfull), jnp.float32)],
        ),
        compiler_params=pltpu.CompilerParams(
            dimension_semantics=("parallel",)),
    )(*args)

    # (N, Cout, Hout*Wq) -> NCHW, stripping the Wq padding columns.
    return out.reshape(Nb, cout, Hout, Wq)[:, :, :, :Wout]


# ----------------------- params & pure-JAX reference ------------------------

def init_params(key, cin, cout, exp, ksize):
    cmid = cin * exp
    ks = jax.random.split(key, 8)

    def bn_fold(k, c, eps=1e-5):
        k1, k2, k3, k4 = jax.random.split(k, 4)
        gamma = 1.0 + 0.1 * jax.random.normal(k1, (c,), jnp.float32)
        beta = 0.1 * jax.random.normal(k2, (c,), jnp.float32)
        mean = 0.1 * jax.random.normal(k3, (c,), jnp.float32)
        var = 0.5 + 0.1 * jnp.abs(jax.random.normal(k4, (c,), jnp.float32))
        scale = gamma / jnp.sqrt(var + eps)
        shift = beta - mean * scale
        return scale, shift

    p = {}
    p['w1'] = 0.2 * jax.random.normal(ks[0], (cmid, cin, 1, 1), jnp.float32)
    p['s1'], p['b1'] = bn_fold(ks[1], cmid)
    p['w_dw'] = 0.2 * jax.random.normal(ks[2], (cmid, 1, ksize, ksize), jnp.float32)
    p['s2'], p['b2'] = bn_fold(ks[3], cmid)
    p['w3'] = 0.2 * jax.random.normal(ks[4], (cout, cmid, 1, 1), jnp.float32)
    p['s3'], p['b3'] = bn_fold(ks[5], cout)
    p['wr'] = 0.2 * jax.random.normal(ks[6], (cout, cin, 1, 1), jnp.float32)
    p['sr'], p['br'] = bn_fold(ks[7], cout)
    return p


def reference_forward(x, p, stride, ksize):
    def conv(x, w, strides=(1, 1), padding='VALID', groups=1):
        return lax.conv_general_dilated(
            x, w, strides, padding,
            dimension_numbers=('NCHW', 'OIHW', 'NCHW'),
            feature_group_count=groups)

    def bn(x, scale, shift):
        return x * scale[None, :, None, None] + shift[None, :, None, None]

    h = jnp.clip(bn(conv(x, p['w1']), p['s1'], p['b1']), 0.0, 6.0)
    h = conv(h, p['w_dw'], strides=(stride, stride),
             padding=[(1, 1), (1, 1)], groups=p['w_dw'].shape[0])
    h = jnp.clip(bn(h, p['s2'], p['b2']), 0.0, 6.0)
    h = bn(conv(h, p['w3']), p['s3'], p['b3'])
    if stride == 1:
        cin, cout = x.shape[1], h.shape[1]
        if cin != cout:
            res = bn(conv(x, p['wr']), p['sr'], p['br'])
        else:
            res = x
        return res + h
    return h


# --------------------------------- main --------------------------------------

if __name__ == "__main__":
    key = jax.random.PRNGKey(0)
    kx, kp = jax.random.split(key)
    x = jax.random.normal(kx, (2, 4, 16, 16), jnp.float32)

    expansion, ksize = 6, 3
    configs = [
        dict(cin=4, cout=8, stride=2),   # module defaults: no residual
        dict(cin=4, cout=8, stride=1),   # residual through conv_res branch
        dict(cin=4, cout=4, stride=1),   # identity residual
    ]

    for i, cfg in enumerate(configs):
        p = init_params(jax.random.fold_in(kp, i),
                        cfg['cin'], cfg['cout'], expansion, ksize)
        out = inverted_residual_block(x, p, stride=cfg['stride'], ksize=ksize)
        out = jax.block_until_ready(out)
        ref = reference_forward(x, p, cfg['stride'], ksize)
        assert out.shape == ref.shape, (out.shape, ref.shape)
        err = float(jnp.max(jnp.abs(out - ref)))
        assert err < 5e-4, f"config {cfg}: max abs err {err}"

    print("KERNEL_OK")
</pallas_src>

<mosaic_0001>
module attributes {stable_mosaic.version = 11 : i64} {
  func.func @_fused_irb_kernel(%arg0: i32, %arg1: memref<1x4x640xf32, #tpu.memory_space<vmem>>, %arg2: memref<1x640xf32, #tpu.memory_space<vmem>>, %arg3: memref<24x4xf32, #tpu.memory_space<vmem>>, %arg4: memref<24x1xf32, #tpu.memory_space<vmem>>, %arg5: memref<24x9xf32, #tpu.memory_space<vmem>>, %arg6: memref<24x1xf32, #tpu.memory_space<vmem>>, %arg7: memref<8x24xf32, #tpu.memory_space<vmem>>, %arg8: memref<8x1xf32, #tpu.memory_space<vmem>>, %arg9: memref<1x8x128xf32, #tpu.memory_space<vmem>>, %arg10: memref<24x640xf32, #tpu.memory_space<vmem>>) attributes {dimension_semantics = [#tpu.dimension_semantics<parallel>], iteration_bounds = array<i64: 2>, scalar_prefetch = 0 : i64, scratch_operands = 1 : i64, tpu.core_type = #tpu.core_type<tc>, window_params = [{transform_indices = @transform_0, window_bounds = array<i64: 1, 4, 640>}, {pipeline_mode = #tpu.pipeline_mode<synchronous>, transform_indices = @transform_1, window_bounds = array<i64: 1, 640>}, {pipeline_mode = #tpu.pipeline_mode<synchronous>, transform_indices = @transform_2, window_bounds = array<i64: 24, 4>}, {pipeline_mode = #tpu.pipeline_mode<synchronous>, transform_indices = @transform_3, window_bounds = array<i64: 24, 1>}, {pipeline_mode = #tpu.pipeline_mode<synchronous>, transform_indices = @transform_4, window_bounds = array<i64: 24, 9>}, {pipeline_mode = #tpu.pipeline_mode<synchronous>, transform_indices = @transform_5, window_bounds = array<i64: 24, 1>}, {pipeline_mode = #tpu.pipeline_mode<synchronous>, transform_indices = @transform_6, window_bounds = array<i64: 8, 24>}, {pipeline_mode = #tpu.pipeline_mode<synchronous>, transform_indices = @transform_7, window_bounds = array<i64: 8, 1>}, {transform_indices = @transform_8, window_bounds = array<i64: 1, 8, 128>}]} {
    %c0 = arith.constant 0 : index
    %c0_0 = arith.constant 0 : index
    %0 = vector.load %arg3[%c0, %c0_0] : memref<24x4xf32, #tpu.memory_space<vmem>>, vector<24x4xf32>
    %c0_1 = arith.constant 0 : index
    %c0_2 = arith.constant 0 : index
    %c0_3 = arith.constant 0 : index
    %1 = vector.load %arg1[%c0_1, %c0_2, %c0_3] : memref<1x4x640xf32, #tpu.memory_space<vmem>>, vector<1x4x640xf32>
    %2 = vector.shape_cast %1 : vector<1x4x640xf32> to vector<4x640xf32>
    %cst = arith.constant dense<0.000000e+00> : vector<24x640xf32>
    %3 = tpu.matmul %0, %2, %cst {dimension_numbers = #tpu.dot_dimension_numbers<[1], [0], [0], [1], [0, 0, 1, 1], [], []>} : vector<24x4xf32>, vector<4x640xf32>, vector<24x640xf32> -> vector<24x640xf32>
    %c0_4 = arith.constant 0 : index
    %c0_5 = arith.constant 0 : index
    %4 = vector.load %arg4[%c0_4, %c0_5] : memref<24x1xf32, #tpu.memory_space<vmem>>, vector<24x1xf32>
    %5 = vector.broadcast %4 : vector<24x1xf32> to vector<24x640xf32>
    %6 = arith.addf %3, %5 : vector<24x640xf32>
    %cst_6 = arith.constant 0.000000e+00 : f32
    %cst_7 = arith.constant 6.000000e+00 : f32
    %7 = vector.broadcast %cst_6 : f32 to vector<24x640xf32>
    %8 = arith.maximumf %7, %6 : vector<24x640xf32>
    %9 = vector.broadcast %cst_7 : f32 to vector<24x640xf32>
    %10 = arith.minimumf %9, %8 : vector<24x640xf32>
    %c0_8 = arith.constant 0 : index
    %c0_9 = arith.constant 0 : index
    %11 = vector.load %arg2[%c0_8, %c0_9] : memref<1x640xf32, #tpu.memory_space<vmem>>, vector<1x640xf32>
    %12 = vector.broadcast %11 : vector<1x640xf32> to vector<24x640xf32>
    %13 = arith.mulf %10, %12 : vector<24x640xf32>
    %c0_10 = arith.constant 0 : index
    %c0_11 = arith.constant 0 : index
    %14 = vector.load %arg10[%c0_10, %c0_11] : memref<24x640xf32, #tpu.memory_space<vmem>>, vector<24x640xf32>
    tpu.vector_store %arg10[%c0_10, %c0_11], %13 {strides = array<i32>} : memref<24x640xf32, #tpu.memory_space<vmem>>, vector<24x640xf32>,
    %cst_12 = arith.constant 0.000000e+00 : f32
    %15 = vector.broadcast %cst_12 : f32 to vector<24x128xf32>
    %c0_13 = arith.constant 0 : index
    %c0_14 = arith.constant 0 : index
    %16 = vector.load %arg10[%c0_13, %c0_14] : memref<24x640xf32, #tpu.memory_space<vmem>>, vector<24x640xf32>
    %17 = vector.extract_strided_slice %16 {offsets = [0, 0], sizes = [24, 128], strides = [1, 1]} : vector<24x640xf32> to vector<24x128xf32>
    %c0_15 = arith.constant 0 : index
    %c0_16 = arith.constant 0 : index
    %18 = vector.load %arg5[%c0_15, %c0_16] : memref<24x9xf32, #tpu.memory_space<vmem>>, vector<24x1xf32>
    %19 = vector.broadcast %18 : vector<24x1xf32> to vector<24x128xf32>
    %20 = arith.mulf %17, %19 : vector<24x128xf32>
    %21 = arith.addf %15, %20 : vector<24x128xf32>
    %c0_17 = arith.constant 0 : index
    %c0_18 = arith.constant 0 : index
    %22 = vector.load %arg10[%c0_17, %c0_18] : memref<24x640xf32, #tpu.memory_space<vmem>>, vector<24x640xf32>
    %c496_i32 = arith.constant 496 : i32
    %23 = tpu.dynamic_rotate %22 by %c496_i32 dim 1 : vector<24x640xf32>, i32 -> vector<24x640xf32>
    %24 = vector.extract_strided_slice %23 {offsets = [0, 0], sizes = [24, 128], strides = [1, 1]} : vector<24x640xf32> to vector<24x128xf32>
    %c0_19 = arith.constant 0 : index
    %c1 = arith.constant 1 : index
    %25 = vector.load %arg5[%c0_19, %c1] : memref<24x9xf32, #tpu.memory_space<vmem>>, vector<24x1xf32>
    %26 = vector.broadcast %25 : vector<24x1xf32> to vector<24x128xf32>
    %27 = arith.mulf %24, %26 : vector<24x128xf32>
    %28 = arith.addf %21, %27 : vector<24x128xf32>
    %c0_20 = arith.constant 0 : index
    %c0_21 = arith.constant 0 : index
    %29 = vector.load %arg10[%c0_20, %c0_21] : memref<24x640xf32, #tpu.memory_space<vmem>>, vector<24x640xf32>
    %c639_i32 = arith.constant 639 : i32
    %30 = tpu.dynamic_rotate %29 by %c639_i32 dim 1 : vector<24x640xf32>, i32 -> vector<24x640xf32>
    %31 = vector.extract_strided_slice %30 {offsets = [0, 0], sizes = [24, 128], strides = [1, 1]} : vector<24x640xf32> to vector<24x128xf32>
    %c0_22 = arith.constant 0 : index
    %c2 = arith.constant 2 : index
    %32 = vector.load %arg5[%c0_22, %c2] : memref<24x9xf32, #tpu.memory_space<vmem>>, vector<24x1xf32>
    %33 = vector.broadcast %32 : vector<24x1xf32> to vector<24x128xf32>
    %34 = arith.mulf %31, %33 : vector<24x128xf32>
    %35 = arith.addf %28, %34 : vector<24x128xf32>
    %c0_23 = arith.constant 0 : index
    %c0_24 = arith.constant 0 : index
    %36 = vector.load %arg10[%c0_23, %c0_24] : memref<24x640xf32, #tpu.memory_space<vmem>>, vector<24x640xf32>
    %c352_i32 = arith.constant 352 : i32
    %37 = tpu.dynamic_rotate %36 by %c352_i32 dim 1 : vector<24x640xf32>, i32 -> vector<24x640xf32>
    %38 = vector.extract_strided_slice %37 {offsets = [0, 0], sizes = [24, 128], strides = [1, 1]} : vector<24x640xf32> to vector<24x128xf32>
    %c0_25 = arith.constant 0 : index
    %c3 = arith.constant 3 : index
    %39 = vector.load %arg5[%c0_25, %c3] : memref<24x9xf32, #tpu.memory_space<vmem>>, vector<24x1xf32>
    %40 = vector.broadcast %39 : vector<24x1xf32> to vector<24x128xf32>
    %41 = arith.mulf %38, %40 : vector<24x128xf32>
    %42 = arith.addf %35, %41 : vector<24x128xf32>
    %c0_26 = arith.constant 0 : index
    %c0_27 = arith.constant 0 : index
    %43 = vector.load %arg10[%c0_26, %c0_27] : memref<24x640xf32, #tpu.memory_space<vmem>>, vector<24x640xf32>
    %c208_i32 = arith.constant 208 : i32
    %44 = tpu.dynamic_rotate %43 by %c208_i32 dim 1 : vector<24x640xf32>, i32 -> vector<24x640xf32>
    %45 = vector.extract_strided_slice %44 {offsets = [0, 0], sizes = [24, 128], strides = [1, 1]} : vector<24x640xf32> to vector<24x128xf32>
    %c0_28 = arith.constant 0 : index
    %c4 = arith.constant 4 : index
    %46 = vector.load %arg5[%c0_28, %c4] : memref<24x9xf32, #tpu.memory_space<vmem>>, vector<24x1xf32>
    %47 = vector.broadcast %46 : vector<24x1xf32> to vector<24x128xf32>
    %48 = arith.mulf %45, %47 : vector<24x128xf32>
    %49 = arith.addf %42, %48 : vector<24x128xf32>
    %c0_29 = arith.constant 0 : index
    %c0_30 = arith.constant 0 : index
    %50 = vector.load %arg10[%c0_29, %c0_30] : memref<24x640xf32, #tpu.memory_space<vmem>>, vector<24x640xf32>
    %c351_i32 = arith.constant 351 : i32
    %51 = tpu.dynamic_rotate %50 by %c351_i32 dim 1 : vector<24x640xf32>, i32 -> vector<24x640xf32>
    %52 = vector.extract_strided_slice %51 {offsets = [0, 0], sizes = [24, 128], strides = [1, 1]} : vector<24x640xf32> to vector<24x128xf32>
    %c0_31 = arith.constant 0 : index
    %c5 = arith.constant 5 : index
    %53 = vector.load %arg5[%c0_31, %c5] : memref<24x9xf32, #tpu.memory_space<vmem>>, vector<24x1xf32>
    %54 = vector.broadcast %53 : vector<24x1xf32> to vector<24x128xf32>
    %55 = arith.mulf %52, %54 : vector<24x128xf32>
    %56 = arith.addf %49, %55 : vector<24x128xf32>
    %c0_32 = arith.constant 0 : index
    %c0_33 = arith.constant 0 : index
    %57 = vector.load %arg10[%c0_32, %c0_33] : memref<24x640xf32, #tpu.memory_space<vmem>>, vector<24x640xf32>
    %c624_i32 = arith.constant 624 : i32
    %58 = tpu.dynamic_rotate %57 by %c624_i32 dim 1 : vector<24x640xf32>, i32 -> vector<24x640xf32>
    %59 = vector.extract_strided_slice %58 {offsets = [0, 0], sizes = [24, 128], strides = [1, 1]} : vector<24x640xf32> to vector<24x128xf32>
    %c0_34 = arith.constant 0 : index
    %c6 = arith.constant 6 : index
    %60 = vector.load %arg5[%c0_34, %c6] : memref<24x9xf32, #tpu.memory_space<vmem>>, vector<24x1xf32>
    %61 = vector.broadcast %60 : vector<24x1xf32> to vector<24x128xf32>
    %62 = arith.mulf %59, %61 : vector<24x128xf32>
    %63 = arith.addf %56, %62 : vector<24x128xf32>
    %c0_35 = arith.constant 0 : index
    %c0_36 = arith.constant 0 : index
    %64 = vector.load %arg10[%c0_35, %c0_36] : memref<24x640xf32, #tpu.memory_space<vmem>>, vector<24x640xf32>
    %c480_i32 = arith.constant 480 : i32
    %65 = tpu.dynamic_rotate %64 by %c480_i32 dim 1 : vector<24x640xf32>, i32 -> vector<24x640xf32>
    %66 = vector.extract_strided_slice %65 {offsets = [0, 0], sizes = [24, 128], strides = [1, 1]} : vector<24x640xf32> to vector<24x128xf32>
    %c0_37 = arith.constant 0 : index
    %c7 = arith.constant 7 : index
    %67 = vector.load %arg5[%c0_37, %c7] : memref<24x9xf32, #tpu.memory_space<vmem>>, vector<24x1xf32>
    %68 = vector.broadcast %67 : vector<24x1xf32> to vector<24x128xf32>
    %69 = arith.mulf %66, %68 : vector<24x128xf32>
    %70 = arith.addf %63, %69 : vector<24x128xf32>
    %c0_38 = arith.constant 0 : index
    %c0_39 = arith.constant 0 : index
    %71 = vector.load %arg10[%c0_38, %c0_39] : memref<24x640xf32, #tpu.memory_space<vmem>>, vector<24x640xf32>
    %c623_i32 = arith.constant 623 : i32
    %72 = tpu.dynamic_rotate %71 by %c623_i32 dim 1 : vector<24x640xf32>, i32 -> vector<24x640xf32>
    %73 = vector.extract_strided_slice %72 {offsets = [0, 0], sizes = [24, 128], strides = [1, 1]} : vector<24x640xf32> to vector<24x128xf32>
    %c0_40 = arith.constant 0 : index
    %c8 = arith.constant 8 : index
    %74 = vector.load %arg5[%c0_40, %c8] : memref<24x9xf32, #tpu.memory_space<vmem>>, vector<24x1xf32>
    %75 = vector.broadcast %74 : vector<24x1xf32> to vector<24x128xf32>
    %76 = arith.mulf %73, %75 : vector<24x128xf32>
    %77 = arith.addf %70, %76 : vector<24x128xf32>
    %c0_41 = arith.constant 0 : index
    %c0_42 = arith.constant 0 : index
    %78 = vector.load %arg6[%c0_41, %c0_42] : memref<24x1xf32, #tpu.memory_space<vmem>>, vector<24x1xf32>
    %79 = vector.broadcast %78 : vector<24x1xf32> to vector<24x128xf32>
    %80 = arith.addf %77, %79 : vector<24x128xf32>
    %cst_43 = arith.constant 0.000000e+00 : f32
    %cst_44 = arith.constant 6.000000e+00 : f32
    %81 = vector.broadcast %cst_43 : f32 to vector<24x128xf32>
    %82 = arith.maximumf %81, %80 : vector<24x128xf32>
    %83 = vector.broadcast %cst_44 : f32 to vector<24x128xf32>
    %84 = arith.minimumf %83, %82 : vector<24x128xf32>
    %c0_45 = arith.constant 0 : index
    %c0_46 = arith.constant 0 : index
    %85 = vector.load %arg7[%c0_45, %c0_46] : memref<8x24xf32, #tpu.memory_space<vmem>>, vector<8x24xf32>
    %cst_47 = arith.constant dense<0.000000e+00> : vector<8x128xf32>
    %86 = tpu.matmul %85, %84, %cst_47 {dimension_numbers = #tpu.dot_dimension_numbers<[1], [0], [0], [1], [0, 0, 1, 1], [], []>} : vector<8x24xf32>, vector<24x128xf32>, vector<8x128xf32> -> vector<8x128xf32>
    %c0_48 = arith.constant 0 : index
    %c0_49 = arith.constant 0 : index
    %87 = vector.load %arg8[%c0_48, %c0_49] : memref<8x1xf32, #tpu.memory_space<vmem>>, vector<8x1xf32>
    %88 = vector.broadcast %87 : vector<8x1xf32> to vector<8x128xf32>
    %89 = arith.addf %86, %88 : vector<8x128xf32>
    %c0_50 = arith.constant 0 : index
    %c0_51 = arith.constant 0 : index
    %c0_52 = arith.constant 0 : index
    %90 = vector.load %arg9[%c0_50, %c0_51, %c0_52] : memref<1x8x128xf32, #tpu.memory_space<vmem>>, vector<1x8x128xf32>
    %91 = vector.shape_cast %90 : vector<1x8x128xf32> to vector<8x128xf32>
    %92 = vector.shape_cast %89 : vector<8x128xf32> to vector<1x8x128xf32>
    tpu.vector_store %arg9[%c0_50, %c0_51, %c0_52], %92 {strides = array<i32>} : memref<1x8x128xf32, #tpu.memory_space<vmem>>, vector<1x8x128xf32>,
    return
  }
  func.func @transform_0(%arg0: i32) -> (i32, i32, i32) {
    %c0_i32 = arith.constant 0 : i32
    %c0_i32_0 = arith.constant 0 : i32
    %c0_i32_1 = arith.constant 0 : i32
    return %arg0, %c0_i32, %c0_i32_0 : i32, i32, i32
  }
  func.func @transform_1(%arg0: i32) -> (i32, i32) {
    %c0_i32 = arith.constant 0 : i32
    %c0_i32_0 = arith.constant 0 : i32
    %c0_i32_1 = arith.constant 0 : i32
    return %c0_i32, %c0_i32_0 : i32, i32
  }
  func.func @transform_2(%arg0: i32) -> (i32, i32) {
    %c0_i32 = arith.constant 0 : i32
    %c0_i32_0 = arith.constant 0 : i32
    %c0_i32_1 = arith.constant 0 : i32
    return %c0_i32, %c0_i32_0 : i32, i32
  }
  func.func @transform_3(%arg0: i32) -> (i32, i32) {
    %c0_i32 = arith.constant 0 : i32
    %c0_i32_0 = arith.constant 0 : i32
    %c0_i32_1 = arith.constant 0 : i32
    return %c0_i32, %c0_i32_0 : i32, i32
  }
  func.func @transform_4(%arg0: i32) -> (i32, i32) {
    %c0_i32 = arith.constant 0 : i32
    %c0_i32_0 = arith.constant 0 : i32
    %c0_i32_1 = arith.constant 0 : i32
    return %c0_i32, %c0_i32_0 : i32, i32
  }
  func.func @transform_5(%arg0: i32) -> (i32, i32) {
    %c0_i32 = arith.constant 0 : i32
    %c0_i32_0 = arith.constant 0 : i32
    %c0_i32_1 = arith.constant 0 : i32
    return %c0_i32, %c0_i32_0 : i32, i32
  }
  func.func @transform_6(%arg0: i32) -> (i32, i32) {
    %c0_i32 = arith.constant 0 : i32
    %c0_i32_0 = arith.constant 0 : i32
    %c0_i32_1 = arith.constant 0 : i32
    return %c0_i32, %c0_i32_0 : i32, i32
  }
  func.func @transform_7(%arg0: i32) -> (i32, i32) {
    %c0_i32 = arith.constant 0 : i32
    %c0_i32_0 = arith.constant 0 : i32
    %c0_i32_1 = arith.constant 0 : i32
    return %c0_i32, %c0_i32_0 : i32, i32
  }
  func.func @transform_8(%arg0: i32) -> (i32, i32, i32) {
    %c0_i32 = arith.constant 0 : i32
    %c0_i32_0 = arith.constant 0 : i32
    %c0_i32_1 = arith.constant 0 : i32
    return %arg0, %c0_i32, %c0_i32_0 : i32, i32, i32
  }
}

</mosaic_0001>

<bundles_post_ra>
// kernel: tpu_custom_call.1
= control target key start
LH: loop header
LB: loop body
LE: loop exit
PB: predicated region body
PF: predicated region fallthrough
CT: control target
= control target key end

     0   :  { %13 = vsyncpa [#allocation4], 0  ;;  %s1932_s0 = inlined_call_operand.vmem [shape: f32[2,4,640], index: 0, kind: input, shape index: {}]   ;;  %s1933_s1 = inlined_call_operand.vmem [shape: f32[1,640], index: 1, kind: input, shape index: {}]   ;;  %s1934_s2 = inlined_call_operand.vmem [shape: f32[24,4], index: 2, kind: input, shape index: {}]   ;;  %s1935_s3 = inlined_call_operand.vmem [shape: f32[24,1], index: 3, kind: input, shape index: {}]   ;;  %s1936_s4 = inlined_call_operand.vmem [shape: f32[24,9], index: 4, kind: input, shape index: {}]   ;;  %s1937_s5 = inlined_call_operand.vmem [shape: f32[24,1], index: 5, kind: input, shape index: {}]   ;;  %s1938_s6 = inlined_call_operand.vmem [shape: f32[8,24], index: 6, kind: input, shape index: {}]   ;;  %s1939_s7 = inlined_call_operand.vmem [shape: f32[8,1], index: 7, kind: input, shape index: {}]   ;;  %s1940_s8 = inlined_call_operand.hbm [shape: f32[2,8,128], index: 8, kind: output, shape index: {}]  }
   0x1   :  { %15 = vsyncpa [#allocation4 + $0x1], 0  ;;  %s1435_s27 = smov 0   ;;  %s1437_s28 = smov 0  }
   0x2   :  { %s1439_s29 = smov 0   ;;  %s1441_s30 = smov 0  }
   0x3 LB: > { %s1456_s9 = sadd.s32 4294967295, %s1369_s30   ;;  %s1168_s10 = sadd.s32 4294967294, %s1369_s30   ;;  %s1369_s30 = sphi %s1441_s30, %s1956_s30   ;;  %s1365_s29 = sphi %s1439_s29, %s1955_s29   ;;  %s1361_s28 = sphi %s1437_s28, %s1954_s28   ;;  %s1357_s27 = sphi %s1435_s27, %s1953_s27  }
   0x4   : > { %s1460_s11 = sadd.s32 1, %s1369_s30   ;;  %s201_s12 = sadd.s32 1, %s1365_s29 }
   0x5   : > { %s198_s13 = ssub.s32 %s1369_s30, %s1460_s11  ;;  %p211_p0 = scmp.ne.s32.totalorder %s1365_s29, %s1361_s28 }
   0x6   : > { %p199_p1 = scmp.eq.s32.totalorder %s198_s13, 0  ;;  %p212_p2 = scmp.eq.s32.totalorder %s1456_s9, 1 }
   0x7   : > { %p217_p3 = scmp.ne.s32.totalorder %s1361_s28, %s1357_s27  ;;  %p218_p4 = scmp.eq.s32.totalorder %s1168_s10, 1 }
   0x8   : > { %s1471_s14 = scalar_select %p199_p1, %s1365_s29, %s201_s12  }
   0x9   : > { %p1473_p5 = por %p212_p2, %p211_p0  ;;  %p1477_p6 = por %p218_p4, %p217_p3 }
   0xa   : > { %p1171_p7 = scmp.ge.s32.totalorder %s1369_s30, 1  ;;  %p265_p8 = scmp.lt.s32.totalorder %s1369_s30, 3 }
   0xc   : > { %p266_p9 = pnand %p1171_p7, %p265_p8 }
   0xe   : > { %269 = sbr.rel (%p266_p9) target bundleno = 700 (0x2bc), region = 52 }
  0x15   : > { %p299_p10 = scmp.lt.s32.totalorder %s1456_s9, 1  ;;  %v1941_v0 = vmov 0.0   ;;  %v310_v1 = vld [vmem:[%s1935_s3] sm:$0xff]  ;;  %v1372_v2 = vmov 0   ;;  %v312_v3 = vld [vmem:[%s1935_s3 + $0x10] sm:$0xff]  ;;  %v311_v4 = vld [vmem:[%s1935_s3 + $0x8] sm:$0xff]  ;;  %v632_v26 = vlaneseq }
  0x16   : > { %418 = vmatprep.mubr.f32.mxu0 %v1941_v0  ;;  %430 = vmatprep.mubr.f32.mxu1 %v1941_v0  ;;  %v1504_v5 = vld [vmem:[%s1936_s4] sm:$0xff]  ;;  %vm343_vm0 = vcmask 1043456   ;;  %vm333_vm1 = vcmask 31744   ;;  %v306_v10 = vld [vmem:[%s1934_s2 + $0x10] sm:$0xff]  ;;  %v305_v12 = vld [vmem:[%s1934_s2 + $0x8] sm:$0xff]  ;;  %v1373_v14 = vmov 1  }
  0x17   : > { %s300_s19 = scalar_select %p299_p10, %s1456_s9, 1  ;;  %1284 = vset.pattern.permute.xlu0 %v1372_v2  ;;  %1285 = vset.pattern.permute.xlu1 %v1372_v2  ;;  %v304_v9 = vld [vmem:[%s1934_s2] sm:$0xff]  ;;  %v1530_v15 = vld [vmem:[%s1936_s4 + $0x8] sm:$0xff]  ;;  %vm1374_vm2 = vmmov 0   ;;  %v704_v16 = vld [vmem:[%s1936_s4 + $0x10] sm:$0xff]  ;;  %v1375_v17 = vmov 2  }
  0x18   : > { %315 = vperm.xlu0 %1284, %v310_v1   ;;  %325 = vperm.xlu1 %1285, %v312_v3   ;;  %v1376_v18 = vmov 3   ;;  %v1377_v19 = vmov 4   ;;  %v1378_v20 = vmov 5   ;;  %v1379_v21 = vmov 6   ;;  %v986_v24 = vld [vmem:[%s1937_s5] sm:$0xff]  ;;  %v987_v25 = vld [vmem:[%s1937_s5 + $0x8] sm:$0xff] }
  0x19   : > { %s1226_s22 = smul.u32 20, %s300_s19  ;;  %v1380_v22 = vmov 7   ;;  %v1381_v23 = vmov 8   ;;  %v1576_v27 = vshrl.u32 %v632_v26, 7  ;;  %v1586_v32 = vld [vmem:[%s1933_s1] sm:$0x1f] }
  0x1a   : > { %s1382_s20 = smov 112   ;;  %s1383_s21 = smov 127   ;;  %vm1020_vm9 = vcmask 195584  }
  0x1b   : > { %s303_s10 = scalar_lea.vmem %s1932_s0, %s1226_s22  ;;  %v634_v30 = vsub.s32 0, %v1576_v27  ;;  %v638_v39 = vsub.s32 1, %v1576_v27  ;;  %s1384_s22 = smov 96  }
  0x1c   : > { %v307_v6 = vld [vmem:[%s303_s10] sm:$0xff]  ;;  %v308_v7 = vld [vmem:[%s303_s10 + $0x8] sm:$0xff]  ;;  %320 = vperm.xlu0 %1284, %v311_v4   ;;  %707 = vperm.xlu1 %1285, %v1504_v5   ;;  %v309_v13 = vld [vmem:[%s303_s10 + $0x10] sm:$0xf]  ;;  %s1385_s23 = smov 111   ;;  %s1386_s24 = smov 95  }
  0x1d   : > { %v331_v8 = vcombine.high %v307_v6, %v307_v6  ;;  %v332_v11 = vcombine.high %v308_v7, %v308_v7  ;;  %v635_v41 = vrot.slane %v1586_v32, %v634_v30  ;;  %v639_v51 = vrot.slane %v1586_v32, %v638_v39  ;;  %s1387_s25 = smov 80   ;;  %s296_s19 = sand.u32 1, %s1361_s28  }
  0x1e   : > { %s1096_s10 = scalar_lea.sflag [#allocation4], %s296_s19 }
  0x1f   : > { %1174 = vmatprep.subr.msk.mxu0 %vm343_vm0, %v331_v8  ;;  %1224 = vmatprep.subr.msk.mxu1 %vm343_vm0, %v331_v8 }
  0x20   : > { %1175 = vmatpush1.msk.msra.mxu0 %vm343_vm0, %v307_v6  ;;  %1225 = vmatpush1.msk.msra.mxu1 %vm343_vm0, %v307_v6 }
  0x21   : > { %1176 = vmatmul.mubr.msk.f32.vlgmr.msra.gmra.mrb[0].mxu0 %vm333_vm1, %v304_v9  ;;  %1178 = vmatmul.mubr.msk.f32.vlgmr.msra.gmra.mrb[0].mxu1 %vm333_vm1, %v306_v10 }
  0x22   : > { %1179 = vmatprep.subr.msk.mxu1 %vm343_vm0, %v332_v11  ;;  %424 = vmatprep.mubr.f32.mxu0 %v1941_v0 }
  0x23   : > { %1180 = vmatpush1.msk.msra.mxu1 %vm343_vm0, %v308_v7  ;;  %501 = vmatprep.mubr.f32.mxu1 %v1941_v0 }
  0x24   : > { %1201 = vmatprep.subr.mxu0 %v1941_v0  ;;  %1287 = vset.pattern.permute.xlu0 %v1373_v14 }
  0x25   : > { %1177 = vmatmul.mubr.msk.f32.gmra.mrb[2].mxu0 %vm333_vm1, %v305_v12  ;;  %1181 = vmatmul.mubr.msk.f32.vlgmr.msra.gmra.mrb[2].mxu1 %vm333_vm1, %v304_v9 }
  0x26   : > { %507 = vmatprep.mubr.f32.mxu1 %v1941_v0  ;;  %1202 = vmatpush3.msk.msra.mxu0 %vm343_vm0, %v309_v13 }
  0x27   : > { %1203 = vmatprep.mubr.msk.f32.mxu0 %vm1374_vm2, %v1941_v0  ;;  %749 = vperm.xlu0 %1287, %v1530_v15  }
  0x28   : > { %1286 = vset.pattern.permute.xlu1 %v1373_v14 }
  0x29   : > { %1182 = vmatmul.mubr.msk.f32.gmra.mrb[4].mxu1 %vm333_vm1, %v305_v12  ;;  %1204 = vmatmul.mubr.msk.f32.vlgmr.msra.gmra.mrb[4].mxu0 %vm333_vm1, %v304_v9 }
  0x2a   : > { %513 = vmatprep.mubr.f32.mxu1 %v1941_v0  ;;  %1206 = vmatprep.mubr.msk.f32.mxu0 %vm1374_vm2, %v1941_v0 }
  0x2b   : > { %753 = vperm.xlu0 %1287, %v704_v16   ;;  %745 = vperm.xlu1 %1286, %v1504_v5  }
  0x2d   : > { %1183 = vmatmul.mubr.msk.f32.gmra.mrb[6].mxu1 %vm333_vm1, %v306_v10  ;;  %1207 = vmatmul.mubr.msk.f32.gmra.mrb[6].mxu0 %vm333_vm1, %v305_v12 }
  0x2e   : > { %1209 = vmatprep.mubr.msk.f32.mxu0 %vm1374_vm2, %v1941_v0  ;;  %1218 = vmatprep.mubr.msk.f32.mxu1 %vm1374_vm2, %v1941_v0 }
  0x2f   : > { %1292 = vset.pattern.permute.xlu0 %v1375_v17  ;;  %1288 = vset.pattern.permute.xlu1 %v1375_v17 }
  0x30   : > { %787 = vperm.xlu0 %1292, %v704_v16   ;;  %779 = vperm.xlu1 %1288, %v1504_v5  }
  0x31   : > { %1210 = vmatmul.mubr.msk.f32.gmra.mrb[8].mxu0 %vm333_vm1, %v306_v10 }
  0x34   : > { %1293 = vset.pattern.permute.xlu0 %v1376_v18  ;;  %783 = vperm.xlu1 %1288, %v1530_v15  }
  0x35   : > { %813 = vperm.xlu0 %1293, %v1504_v5  }
  0x38   : > { %1289 = vset.pattern.permute.xlu1 %v1376_v18 }
  0x39   : > { %821 = vperm.xlu0 %1293, %v704_v16   ;;  %817 = vperm.xlu1 %1289, %v1530_v15  }
  0x3d   : > { %1296 = vset.pattern.permute.xlu0 %v1377_v19  ;;  %1290 = vset.pattern.permute.xlu1 %v1372_v2 }
  0x3e   : > { %855 = vperm.xlu0 %1296, %v704_v16   ;;  %717 = vperm.xlu1 %1290, %v704_v16  }
  0x42   : > { %1298 = vset.pattern.permute.xlu0 %v1378_v20  ;;  %1291 = vset.pattern.permute.xlu1 %v1377_v19 }
  0x43   : > { %889 = vperm.xlu0 %1298, %v704_v16   ;;  %847 = vperm.xlu1 %1291, %v1504_v5  }
  0x47   : > { %1300 = vset.pattern.permute.xlu0 %v1379_v21  ;;  %851 = vperm.xlu1 %1291, %v1530_v15  }
  0x48   : > { %916 = vperm.xlu0 %1300, %v704_v16  }
  0x4b   : > { %1294 = vset.pattern.permute.xlu1 %v1378_v20  ;;  %v642_v20 = vsub.s32 2, %v1576_v27 }
  0x4c   : > { %1301 = vset.pattern.permute.xlu0 %v1380_v22  ;;  %881 = vperm.xlu1 %1294, %v1504_v5  }
  0x4d   : > { %943 = vperm.xlu0 %1301, %v704_v16  }
  0x50   : > { %885 = vperm.xlu1 %1294, %v1530_v15  }
  0x51   : > { %1303 = vset.pattern.permute.xlu0 %v1381_v23 }
  0x52   : > { %977 = vperm.xlu0 %1303, %v704_v16  }
  0x54   : > { %1295 = vset.pattern.permute.xlu1 %v1379_v21 }
  0x55   : > { %908 = vperm.xlu1 %1295, %v1504_v5  }
  0x56   : > { %1304 = vset.pattern.permute.xlu0 %v1372_v2 }
  0x57   : > { %712 = vperm.xlu0 %1304, %v1530_v15  }
  0x59   : > { %912 = vperm.xlu1 %1295, %v1530_v15  }
  0x5d   : > { %1297 = vset.pattern.permute.xlu1 %v1380_v22 }
  0x5e   : > { %935 = vperm.xlu1 %1297, %v1504_v5  }
  0x62   : > { %939 = vperm.xlu1 %1297, %v1530_v15  }
  0x66   : > { %1299 = vset.pattern.permute.xlu1 %v1381_v23 }
  0x67   : > { %969 = vperm.xlu1 %1299, %v1504_v5  }
  0x6b   : > { %973 = vperm.xlu1 %1299, %v1530_v15  }
  0x6f   : > { %1302 = vset.pattern.permute.xlu1 %v1372_v2 }
  0x70   : > { %991 = vperm.xlu1 %1302, %v986_v24   ;;  %v643_v24 = vrot.slane %v1586_v32, %v642_v20 }
  0x74   : > { %996 = vperm.xlu1 %1302, %v987_v25  }
  0x97   : > { %v1578_v28 = vpop.permute.xlu0 %315  ;;  %v1580_v29 = vpop.permute.xlu1 %325 }
  0x9b   : > { %v1595_v50 = vpop.permute.xlu0 %320  ;;  %v1628_v8 = vpop.permute.xlu1 %707 }
  0xaa   : > { %v1637_v14 = vpop.permute.xlu1 %745 }
  0xaf   : > { %v1645_v16 = vpop.permute.xlu1 %779 }
  0xb3   : > { %v1653_v22 = vpop.permute.xlu1 %783 }
  0xb8   : > { %v1660_v30 = vpop.permute.xlu1 %817 }
  0xbd   : > { %v1668_v39 = vpop.permute.xlu1 %717 }
  0xf4   : > { %v420_v31 = vpop.f32.mrb[0].mxu0  ;;  %v432_v33 = vpop.f32.mrb[0].mxu1 }
  0xf5   : > { %v421_v34 = vadd.f32 %v420_v31, %v1578_v28  ;;  %v433_v35 = vadd.f32 %v432_v33, %v1580_v29  ;;  %v434_v36 = vpop.f32.mrb[1].mxu1  ;;  %v422_v37 = vpop.f32.mrb[1].mxu0 }
  0xf6   : > { %v435_v38 = vadd.f32 %v434_v36, %v1580_v29  ;;  %v423_v61 = vadd.f32 %v422_v37, %v1578_v28  ;;  %v646_v36 = vsub.s32 3, %v1576_v27 }
  0xf7   : > { %v600_v40 = vmax.f32 %v421_v34, 0.0  ;;  %v610_v42 = vmax.f32 %v433_v35, 0.0 }
  0xf8   : > { %v611_v43 = vmax.f32 %v435_v38, 0.0  ;;  %v426_v44 = vpop.f32.mrb[2].mxu0  ;;  %v503_v45 = vpop.f32.mrb[2].mxu1  ;;  %v601_v4 = vmax.f32 %v423_v61, 0.0 }
  0xf9   : > { %v615_v46 = vmin.f32 %v600_v40, 6.0  ;;  %v625_v47 = vmin.f32 %v610_v42, 6.0  ;;  %v428_v48 = vpop.f32.mrb[3].mxu0  ;;  %v1593_v49 = vpop.f32.mrb[3].mxu1  ;;  %v427_v55 = vadd.f32 %v426_v44, %v1595_v50  ;;  %v504_v17 = vadd.f32 %v503_v45, %v1578_v28 }
  0xfa   : > { %v626_v54 = vmin.f32 %v611_v43, 6.0  ;;  %v616_v9 = vmin.f32 %v601_v4, 6.0  ;;  %v429_v11 = vadd.f32 %v428_v48, %v1595_v50  ;;  %v506_v33 = vadd.f32 %v1593_v49, %v1578_v28  ;;  %v1675_v43 = vpop.permute.xlu1 %847 }
  0xfb   : > { %v1598_v52 = vmul.f32 %v635_v41, %v615_v46  ;;  %v1600_v53 = vmul.f32 %v635_v41, %v625_v47  ;;  %v605_v62 = vmax.f32 %v427_v55, 0.0  ;;  %v602_v19 = vmax.f32 %v504_v17, 0.0  ;;  %v1681_v47 = vpop.permute.xlu0 %749  ;;  %v1014_v17 = vld [vmem:[%s1939_s7] sm:$0xff] }
  0xfc   : > { %v509_v56 = vpop.f32.mrb[4].mxu1  ;;  %v1603_v57 = vpop.f32.mrb[4].mxu0  ;;  %v1609_v60 = vmul.f32 %v639_v51, %v626_v54  ;;  %v658_v12 = vmul.f32 %v639_v51, %v616_v9  ;;  %v606_v13 = vmax.f32 %v429_v11, 0.0  ;;  %v603_v35 = vmax.f32 %v506_v33, 0.0 }
  0xfd   : > { %v511_v58 = vpop.f32.mrb[5].mxu1  ;;  %902 = vrot.lane.b32.xlu1 %v1600_v53, %s1382_s20  ;;  %762 = vrot.lane.b32.xlu0 %v1598_v52, %s1383_s21  ;;  %v1205_v59 = vpop.f32.mrb[5].mxu0  ;;  %v620_v5 = vmin.f32 %v605_v62, 6.0  ;;  %v510_v21 = vadd.f32 %v509_v56, %v1595_v50  ;;  %v617_v23 = vmin.f32 %v602_v19, 6.0  ;;  %v587_v45 = vadd.f32 %v1603_v57, %v1578_v28 }
  0xfe   : > { %v621_v15 = vmin.f32 %v606_v13, 6.0  ;;  %v512_v38 = vadd.f32 %v511_v58, %v1595_v50  ;;  %v618_v40 = vmin.f32 %v603_v35, 6.0  ;;  %v650_v49 = vsub.s32 4, %v1576_v27  ;;  %v1686_v55 = vpop.permute.xlu1 %851 }
  0xff   : > { %v1630_v10 = vmul.f32 %v635_v41, %v620_v5  ;;  %v607_v25 = vmax.f32 %v510_v21, 0.0  ;;  %v659_v31 = vmul.f32 %v643_v24, %v617_v23  ;;  %v647_v41 = vrot.slane %v1586_v32, %v646_v36  ;;  %v1693_v59 = vpop.permute.xlu0 %753 }
 0x100   : > { %v1612_v63 = vpop.f32.mrb[6].mxu1  ;;  %v1614_v1 = vpop.f32.mrb[6].mxu0  ;;  %v663_v18 = vmul.f32 %v639_v51, %v621_v15  ;;  %v608_v42 = vmax.f32 %v512_v38, 0.0  ;;  %v604_v48 = vmax.f32 %v587_v45, 0.0  ;;  %v651_v56 = vrot.slane %v1586_v32, %v650_v49 }
 0x101   : > { %v1616_v2 = vpop.f32.mrb[7].mxu1  ;;  %772 = vrot.lane.b32.xlu1 %v1609_v60, %s1383_s21  ;;  %766 = vrot.lane.b32.xlu0 %v1600_v53, %s1383_s21  ;;  %v1208_v3 = vpop.f32.mrb[7].mxu0  ;;  %v622_v34 = vmin.f32 %v607_v25, 6.0  ;;  %v660_v44 = vmul.f32 %v647_v41, %v618_v40  ;;  %v516_v54 = vadd.f32 %v1612_v63, %v1580_v29  ;;  %v592_v58 = vadd.f32 %v1614_v1, %v1595_v50 }
 0x102   : > { %v623_v46 = vmin.f32 %v608_v42, 6.0  ;;  %v619_v28 = vmin.f32 %v604_v48, 6.0  ;;  %v1697_v27 = vpop.permute.xlu1 %881  ;;  %v518_v3 = vadd.f32 %v1616_v2, %v1580_v29  ;;  %v1388_v21 = vmov 0.0|0.0  }
 0x103   : > { %v664_v37 = vmul.f32 %v643_v24, %v622_v34  ;;  %v612_v57 = vmax.f32 %v516_v54, 0.0  ;;  %v609_v63 = vmax.f32 %v592_v58, 0.0  ;;  %v1703_v32 = vpop.permute.xlu0 %787  ;;  %1221 = vmatprep.subr.bf16.mxu1 %v1388_v21  ;;  %v1758_v42 = vand.u32 127, %v632_v26 }
 0x104   : > { %v1622_v6 = vpop.f32.mrb[8].mxu0  ;;  %v665_v51 = vmul.f32 %v647_v41, %v623_v46  ;;  %v661_v61 = vmul.f32 %v651_v56, %v619_v28  ;;  %v613_v4 = vmax.f32 %v518_v3, 0.0 }
 0x105   : > { %929 = vrot.lane.b32.xlu1 %v1609_v60, %s1384_s22  ;;  %898 = vrot.lane.b32.xlu0 %v1598_v52, %s1382_s20  ;;  %v1211_v7 = vpop.f32.mrb[9].mxu0  ;;  %v627_v62 = vmin.f32 %v612_v57, 6.0  ;;  %v624_v1 = vmin.f32 %v609_v63, 6.0  ;;  %v597_v15 = vadd.f32 %v1622_v6, %v1580_v29  ;;  %vm774_vm3 = vcmp.lt.s32.totalorder %v1758_v42, 127 }
 0x106   : > { %v1705_v5 = vpop.permute.xlu1 %885  ;;  %v628_v9 = vmin.f32 %v613_v4, 6.0  ;;  %vm740_vm4 = vcmp.lt.s32.totalorder %v1758_v42, 112  ;;  %vm808_vm5 = vcmp.lt.s32.totalorder %v1758_v42, 96  ;;  %vm876_vm6 = vcmp.lt.s32.totalorder %v1758_v42, 95 }
 0x107   : > { %v669_v50 = vmul.f32 %v643_v24, %v627_v62  ;;  %v666_v7 = vmul.f32 %v651_v56, %v624_v1  ;;  %v1709_v11 = vpop.permute.xlu0 %813  ;;  %v614_v19 = vmax.f32 %v597_v15, 0.0  ;;  %vm842_vm7 = vcmp.lt.s32.totalorder %v1758_v42, 80 }
 0x108   : > { %v670_v13 = vmul.f32 %v647_v41, %v628_v9  ;;  %vm964_vm8 = vcmp.lt.s32.totalorder %v1758_v42, 111 }
 0x109   : > { %764 = vrot.lane.b32.xlu1 %v1630_v10, %s1383_s21  ;;  %952 = vrot.lane.b32.xlu0 %v1598_v52, %s1385_s23  ;;  %v629_v23 = vmin.f32 %v614_v19, 6.0 }
 0x10a   : > { %v1713_v2 = vpop.permute.xlu1 %908 }
 0x10b   : > { %v671_v6 = vmul.f32 %v651_v56, %v629_v23 }
 0x10d   : > { %900 = vrot.lane.b32.xlu1 %v1630_v10, %s1382_s20  ;;  %726 = vrot.lane.b32.xlu0 %v658_v12, %s1382_s20 }
 0x10e   : > { %v1726_v20 = vpop.permute.xlu1 %912 }
 0x111   : > { %954 = vrot.lane.b32.xlu1 %v1630_v10, %s1385_s23  ;;  %768 = vrot.lane.b32.xlu0 %v658_v12, %s1383_s21 }
 0x112   : > { %v1732_v29 = vpop.permute.xlu1 %935 }
 0x115   : > { %728 = vrot.lane.b32.xlu1 %v663_v18, %s1382_s20  ;;  %730 = vrot.lane.b32.xlu0 %v1609_v60, %s1382_s20 }
 0x119   : > { %770 = vrot.lane.b32.xlu1 %v663_v18, %s1383_s21  ;;  %925 = vrot.lane.b32.xlu0 %v658_v12, %s1384_s22  ;;  %s1190_s21 = sshll.u32 %s1456_s9, 7  ;;  %s1389_s9 = smov [#allocation3]  }
 0x11a   : > { %s1890_s26 = scalar_lea.hbm %s1940_s8, %s1190_s21  ;;  %s1311_s13 = sshll.u32 %s1389_s9, 4  ;;  %s1312_s13 = int_to_ptr.vmem [resolvable:$false] %s1311_s13 }
 0x11b   : > { %s1313_s17 = scalar_lea.vmem %s1312_s13, 256 }
 0x11d   : > { %927 = vrot.lane.b32.xlu1 %v663_v18, %s1384_s22  ;;  %958 = vrot.lane.b32.xlu0 %v658_v12, %s1385_s23  ;;  %v988_v12 = vld [vmem:[%s1937_s5 + $0x10] sm:$0xff] }
 0x121   : > { %960 = vrot.lane.b32.xlu1 %v663_v18, %s1385_s23  ;;  %732 = vrot.lane.b32.xlu0 %v659_v31, %s1382_s20  ;;  %v1724_v18 = vpop.permute.xlu0 %821 }
 0x125   : > { %734 = vrot.lane.b32.xlu1 %v664_v37, %s1382_s20  ;;  %796 = vrot.lane.b32.xlu0 %v659_v31, %s1384_s22  ;;  %v1729_v24 = vpop.permute.xlu0 %855 }
 0x129   : > { %798 = vrot.lane.b32.xlu1 %v664_v37, %s1384_s22  ;;  %864 = vrot.lane.b32.xlu0 %v659_v31, %s1386_s24  ;;  %v1735_v25 = vpop.permute.xlu0 %889  ;;  %v1737_v31 = vpop.permute.xlu1 %939 }
 0x12d   : > { %866 = vrot.lane.b32.xlu1 %v664_v37, %s1386_s24  ;;  %802 = vrot.lane.b32.xlu0 %v660_v44, %s1384_s22  ;;  %v1741_v33 = vpop.permute.xlu0 %916  ;;  %v1745_v34 = vpop.permute.xlu1 %969 }
 0x12e   : > { %1944 = vst [vmem:[#allocation6_spill] sm:$0xff] %v1741_v33 }
 0x131   : > { %804 = vrot.lane.b32.xlu1 %v665_v51, %s1384_s22  ;;  %830 = vrot.lane.b32.xlu0 %v660_v44, %s1387_s25  ;;  %v1747_v35 = vpop.permute.xlu0 %943  ;;  %v1749_v36 = vpop.permute.xlu1 %973 }
 0x132   : > { %1945 = vst [vmem:[#allocation7_spill] sm:$0xff] %v1747_v35 }
 0x135   : > { %832 = vrot.lane.b32.xlu1 %v665_v51, %s1387_s25  ;;  %870 = vrot.lane.b32.xlu0 %v660_v44, %s1386_s24  ;;  %v1751_v37 = vpop.permute.xlu0 %977  ;;  %v1753_v38 = vpop.permute.xlu1 %991 }
 0x136   : > { %1946 = vst [vmem:[#allocation8_spill] sm:$0xff] %v1751_v37 }
 0x139   : > { %872 = vrot.lane.b32.xlu1 %v665_v51, %s1386_s24  ;;  %836 = vrot.lane.b32.xlu0 %v661_v61, %s1387_s25  ;;  %v713_v40 = vpop.permute.xlu0 %712  ;;  %v1755_v41 = vpop.permute.xlu1 %996 }
 0x13d   : > { %736 = vrot.lane.b32.xlu1 %v669_v50, %s1382_s20  ;;  %800 = vrot.lane.b32.xlu0 %v669_v50, %s1384_s22  ;;  %s1172_s20 = sshll.u32 %s296_s19, 3 }
 0x141   : > { %838 = vrot.lane.b32.xlu1 %v666_v7, %s1387_s25  ;;  %868 = vrot.lane.b32.xlu0 %v669_v50, %s1386_s24 }
 0x145   : > { %806 = vrot.lane.b32.xlu1 %v670_v13, %s1384_s22  ;;  %1001 = vperm.xlu0 %1304, %v988_v12   ;;  %s298_s22 = scalar_lea.vmem [#allocation3], %s1172_s20 }
 0x149   : > { %834 = vrot.lane.b32.xlu1 %v670_v13, %s1387_s25  ;;  %1017 = vperm.xlu0 %1304, %v1014_v17  }
 0x14d   : > { %874 = vrot.lane.b32.xlu1 %v670_v13, %s1386_s24 }
 0x151   : > { %840 = vrot.lane.b32.xlu1 %v671_v6, %s1387_s25 }
 0x155   : > { %956 = vrot.lane.b32.xlu1 %v1600_v53, %s1385_s23 }
 0x159   : > { %962 = vrot.lane.b32.xlu1 %v1609_v60, %s1385_s23  ;;  %s1109_s23 = sshll.u32 %s298_s22, 4  ;;  %s1892_s23 = int_to_ptr.vmem [resolvable:$true] %s1109_s23 }
 0x15a   : > { %s1307_s12 = scalar_lea.vmem %s1892_s23, 128  ;;  %p1314_p0 = scmp.lt.s32.totalorder %s1892_s23, %s1312_s13 }
 0x15b   : > { %p1308_p11 = scmp.ne.s32.totalorder %s1892_s23, %s1307_s12  ;;  %p1315_p1 = scmp.lt.s32.totalorder %s1313_s17, %s1307_s12 }
 0x15d   : > { %p1309_p12 = pnand %p1308_p11, %p1473_p5  ;;  %p1316_p2 = por %p1315_p1, %p1314_p0 }
 0x15f   : > { %p1310_p13 = pneg %p1309_p12 }
 0x161   : > { %p1317_p3 = pnand %p1316_p2, %p1310_p13 }
 0x16f   : > { %v1760_v44 = vpop.permute.xlu1 %902  ;;  %v763_v45 = vpop.permute.xlu0 %762 }
 0x173   : > { %v773_v60 = vpop.permute.xlu1 %772  ;;  %v767_v46 = vpop.permute.xlu0 %766 }
 0x174   : > { %v1765_v48 = vsel %vm774_vm3, %v767_v46, %v773_v60  ;;  %v720_v46 = vmul.f32 %v1628_v8, %v1598_v52 }
 0x177   : > { %v1767_v49 = vpop.permute.xlu1 %929  ;;  %v899_v51 = vpop.permute.xlu0 %898 }
 0x178   : > { %1947 = vst [vmem:[#allocation9_spill] sm:$0xff] %v1767_v49 }
 0x17b   : > { %v765_v54 = vpop.permute.xlu1 %764  ;;  %v1769_v28 = vpop.permute.xlu0 %952 }
 0x17f   : > { %v1771_v56 = vpop.permute.xlu1 %900  ;;  %v727_v26 = vpop.permute.xlu0 %726 }
 0x183   : > { %v1773_v57 = vpop.permute.xlu1 %954  ;;  %v769_v58 = vpop.permute.xlu0 %768 }
 0x184   : > { %v775_v0 = vsel %vm774_vm3, %v763_v45, %v769_v58 }
 0x187   : > { %v1775_v61 = vpop.permute.xlu1 %728  ;;  %v1777_v62 = vpop.permute.xlu0 %730 }
 0x18b   : > { %v771_v63 = vpop.permute.xlu1 %770  ;;  %v926_v3 = vpop.permute.xlu0 %925 }
 0x18f   : > { %v1779_v50 = vpop.permute.xlu1 %927  ;;  %v959_v1 = vpop.permute.xlu0 %958 }
 0x193   : > { %v1781_v4 = vpop.permute.xlu1 %960  ;;  %v733_v7 = vpop.permute.xlu0 %732 }
 0x194   : > { %v741_v21 = vsel %vm740_vm4, %v727_v26, %v733_v7  ;;  %v790_v7 = vmul.f32 %v1645_v16, %v775_v0  ;;  %v904_v0 = vsel %vm740_vm4, %v899_v51, %v727_v26 }
 0x195   : > { %v756_v23 = vmul.f32 %v1637_v14, %v741_v21  ;;  %v919_v51 = vmul.f32 %v1713_v2, %v904_v0 }
 0x197   : > { %v735_v9 = vpop.permute.xlu1 %734  ;;  %v797_v12 = vpop.permute.xlu0 %796  ;;  %v759_v35 = vadd.f32 %v756_v23, %v720_v46 }
 0x198   : > { %v742_v14 = vsel %vm740_vm4, %v1775_v61, %v735_v9  ;;  %v721_v9 = vmul.f32 %v713_v40, %v1630_v10 }
 0x199   : > { %v757_v52 = vmul.f32 %v1681_v47, %v742_v14  ;;  %v793_v8 = vadd.f32 %v790_v7, %v759_v35  ;;  %v776_v47 = vsel %vm774_vm3, %v765_v54, %v771_v63  ;;  %v792_v63 = vmul.f32 %v1703_v32, %v1765_v48 }
 0x19a   : > { %v791_v26 = vmul.f32 %v1653_v22, %v776_v47 }
 0x19b   : > { %v1783_v13 = vpop.permute.xlu1 %798  ;;  %v865_v15 = vpop.permute.xlu0 %864 }
 0x19f   : > { %v867_v17 = vpop.permute.xlu1 %866  ;;  %v803_v19 = vpop.permute.xlu0 %802 }
 0x1a0   : > { %v809_v37 = vsel %vm808_vm5, %v797_v12, %v803_v19 }
 0x1a1   : > { %v824_v21 = vmul.f32 %v1709_v11, %v809_v37  ;;  %v722_v37 = vmul.f32 %v1668_v39, %v1600_v53 }
 0x1a3   : > { %v805_v6 = vpop.permute.xlu1 %804  ;;  %v831_v60 = vpop.permute.xlu0 %830  ;;  %v827_v16 = vadd.f32 %v824_v21, %v793_v8 }
 0x1a4   : > { %v810_v35 = vsel %vm808_vm5, %v1783_v13, %v805_v6 }
 0x1a5   : > { %v825_v53 = vmul.f32 %v1660_v30, %v810_v35 }
 0x1a7   : > { %v833_v33 = vpop.permute.xlu1 %832  ;;  %v871_v49 = vpop.permute.xlu0 %870 }
 0x1a8   : > { %v877_v19 = vsel %vm876_vm6, %v865_v15, %v871_v49  ;;  %v760_v49 = vadd.f32 %v757_v52, %v721_v9 }
 0x1a9   : > { %v892_v15 = vmul.f32 %v1697_v27, %v877_v19 }
 0x1aa   : > { %v794_v6 = vadd.f32 %v791_v26, %v760_v49  ;;  %v1951_v26 = vld [vmem:[#allocation7_spill] sm:$0xff] }
 0x1ab   : > { %v873_v45 = vpop.permute.xlu1 %872  ;;  %v837_v58 = vpop.permute.xlu0 %836 }
 0x1ac   : > { %v843_v23 = vsel %vm842_vm7, %v831_v60, %v837_v58  ;;  %v878_v22 = vsel %vm876_vm6, %v867_v17, %v873_v45 }
 0x1ad   : > { %v858_v11 = vmul.f32 %v1675_v43, %v843_v23  ;;  %v931_v43 = vsel %vm808_vm5, %v926_v3, %v797_v12  ;;  %v965_v12 = vsel %vm964_vm8, %v1769_v28, %v959_v1  ;;  %v893_v28 = vmul.f32 %v1705_v5, %v878_v22 }
 0x1ae   : > { %v946_v2 = vmul.f32 %v1732_v29, %v931_v43  ;;  %v905_v29 = vsel %vm740_vm4, %v1771_v56, %v1775_v61  ;;  %v980_v7 = vmul.f32 %v1745_v34, %v965_v12  ;;  %v966_v56 = vsel %vm964_vm8, %v1773_v57, %v1781_v4  ;;  %v1013_v12 = vld [vmem:[%s1938_s6] sm:$0xff] }
 0x1af   : > { %v861_v10 = vadd.f32 %v858_v11, %v827_v16  ;;  %v737_v40 = vpop.permute.xlu1 %736  ;;  %v920_v17 = vmul.f32 %v1726_v20, %v905_v29  ;;  %v981_v8 = vmul.f32 %v1749_v36, %v966_v56  ;;  %v801_v45 = vpop.permute.xlu0 %800 }
 0x1b0   : > { %v743_v54 = vsel %vm740_vm4, %v1777_v62, %v737_v40 }
 0x1b1   : > { %v895_v39 = vadd.f32 %v892_v15, %v861_v10  ;;  %v758_v27 = vmul.f32 %v1693_v59, %v743_v54  ;;  %v828_v59 = vadd.f32 %v825_v53, %v794_v6  ;;  %v1948_v10 = vld [vmem:[#allocation9_spill] sm:$0xff] }
 0x1b2   : > { %v933_v40 = vsel %vm808_vm5, %v1948_v10, %v801_v45 }
 0x1b3   : > { %v922_v60 = vadd.f32 %v919_v51, %v895_v39  ;;  %v761_v46 = vadd.f32 %v758_v27, %v722_v37  ;;  %v839_v3 = vpop.permute.xlu1 %838  ;;  %v869_v4 = vpop.permute.xlu0 %868  ;;  %v1949_v51 = vld [vmem:[#allocation6_spill] sm:$0xff]  ;;  %v948_v53 = vmul.f32 %v1951_v26, %v933_v40  ;;  %v1952_v27 = vld [vmem:[#allocation8_spill] sm:$0xff] }
 0x1b4   : > { %v844_v30 = vsel %vm842_vm7, %v833_v33, %v839_v3  ;;  %v932_v33 = vsel %vm808_vm5, %v1779_v50, %v1783_v13 }
 0x1b5   : > { %v949_v14 = vadd.f32 %v946_v2, %v922_v60  ;;  %v859_v32 = vmul.f32 %v1686_v55, %v844_v30  ;;  %v795_v48 = vadd.f32 %v792_v63, %v761_v46  ;;  %v947_v34 = vmul.f32 %v1737_v31, %v932_v33 }
 0x1b7   : > { %v862_v1 = vadd.f32 %v859_v32, %v828_v59  ;;  %v807_v21 = vpop.permute.xlu1 %806  ;;  %v983_v52 = vadd.f32 %v980_v7, %v949_v14 }
 0x1b8   : > { %v811_v20 = vsel %vm808_vm5, %v801_v45, %v807_v21 }
 0x1b9   : > { %v896_v55 = vadd.f32 %v893_v28, %v862_v1  ;;  %v1004_v19 = vadd.f32 %v1753_v38, %v983_v52  ;;  %v826_v23 = vmul.f32 %v1724_v18, %v811_v20  ;;  %v906_v18 = vsel %vm740_vm4, %v1760_v44, %v1777_v62 }
 0x1ba   : > { %v921_v43 = vmul.f32 %v1949_v51, %v906_v18 }
 0x1bb   : > { %v923_v61 = vadd.f32 %v920_v17, %v896_v55  ;;  %v835_v5 = vpop.permute.xlu1 %834  ;;  %v1007_v57 = vmax.f32 %v1004_v19, 0.0  ;;  %v829_v38 = vadd.f32 %v826_v23, %v795_v48 }
 0x1bd   : > { %v950_v58 = vadd.f32 %v947_v34, %v923_v61  ;;  %v1010_v47 = vmin.f32 %v1007_v57, 6.0 }
 0x1bf   : > { %v875_v50 = vpop.permute.xlu1 %874  ;;  %v984_v13 = vadd.f32 %v981_v8, %v950_v58 }
 0x1c0   : > { %v879_v36 = vsel %vm876_vm6, %v869_v4, %v875_v50 }
 0x1c1   : > { %v1005_v9 = vadd.f32 %v1755_v41, %v984_v13  ;;  %v894_v41 = vmul.f32 %v1735_v25, %v879_v36 }
 0x1c3   : > { %v841_v31 = vpop.permute.xlu1 %840  ;;  %v1008_v0 = vmax.f32 %v1005_v9, 0.0 }
 0x1c4   : > { %v845_v16 = vsel %vm842_vm7, %v835_v5, %v841_v31  ;;  %v1002_v6 = vpop.permute.xlu0 %1001 }
 0x1c5   : > { %v860_v11 = vmul.f32 %v1729_v24, %v845_v16  ;;  %v1011_v35 = vmin.f32 %v1008_v0, 6.0  ;;  %v1950_v24 = vmov 0.0  }
 0x1c7   : > { %v863_v37 = vadd.f32 %v860_v11, %v829_v38  ;;  %v957_v49 = vpop.permute.xlu1 %956  ;;  %v1222_v15 = vpack.c.bf16 %v1011_v35, %v1010_v47 }
 0x1c8   : > { %v1018_v42 = vpop.permute.xlu0 %1017 }
 0x1c9   : > { %v897_v54 = vadd.f32 %v894_v41, %v863_v37  ;;  %1223 = vmatpush3.bf16.msra.mxu1 %v1222_v15 }
 0x1ca   : > { %1216 = vmatprep.subr.mxu1 %v1950_v24 }
 0x1cb   : > { %v963_v39 = vpop.permute.xlu1 %962  ;;  %v924_v44 = vadd.f32 %v921_v43, %v897_v54 }
 0x1cc   : > { %v967_v25 = vsel %vm964_vm8, %v957_v49, %v963_v39 }
 0x1cd   : > { %v951_v62 = vadd.f32 %v948_v53, %v924_v44  ;;  %v982_v63 = vmul.f32 %v1952_v27, %v967_v25 }
 0x1cf   : > { %v985_v2 = vadd.f32 %v982_v63, %v951_v62 }
 0x1d1   : > { %v1006_v60 = vadd.f32 %v1002_v6, %v985_v2 }
 0x1d3   : > { %v1009_v46 = vmax.f32 %v1006_v60, 0.0 }
 0x1d5   : > { %v1012_v3 = vmin.f32 %v1009_v46, 6.0 }
 0x1d7   : > { %1217 = vmatpush3.msra.mxu1 %v1012_v3 }
 0x1d8   : > { %1219 = vmatmul.mubr.msk.f32.vlgmr.msra.gmra.mrb[8].mxu1 %vm1020_vm9, %v1013_v12 }
 0x2ab   : > { %v1090_v22 = vpop.f32.mrb[8].mxu1 }
 0x2ac   : > { %v1091_v30 = vadd.f32 %v1090_v22, %v1018_v42  ;;  %v1220_v59 = vpop.f32.mrb[9].mxu1 }
 0x2ae   : > { %1094 = vst [vmem:[%s298_s22] sm:$0xff] %v1091_v30 }
 0x2af   : > { %1320 = shalt.err (!%p1317_p3)
}
 0x2b0   : > { %s1321_s18 = scalar_lea.hbm %s1890_s26, 128  ;;  %s1325_s21 = scalar_lea.hbm %s1940_s8, 256 }
 0x2b1   : > { %p1322_p4 = scmp.ne.s32.totalorder %s1890_s26, %s1321_s18  ;;  %p1326_p9 = scmp.lt.u32.totalorder %s1890_s26, %s1940_s8 }
 0x2b2   : > { %p1327_p10 = scmp.lt.u32.totalorder %s1325_s21, %s1321_s18  ;;  %p1329_p12 = scmp.lt.u32.totalorder %s1321_s18, %s1890_s26 }
 0x2b3   : > { %p1323_p7 = pnand %p1322_p4, %p1473_p5 }
 0x2b4   : > { %p1328_p11 = por %p1327_p10, %p1326_p9 }
 0x2b5   : > { %p1324_p8 = pneg %p1323_p7 }
 0x2b6   : > { %p1330_p13 = por %p1329_p12, %p1328_p11 }
 0x2b8   : > { %p1331_p0 = pnand %p1330_p13, %p1324_p8 }
 0x2ba   : > { %1334 = shalt.err (!%p1331_p0)
}
 0x2bb   : > { %1227 = dma.vmem_to_hbm [thread:$0]  (%p1473_p5), %s1892_s23, 128, %s1890_s26, %s1096_s10  }
 0x2bc PF: > { %p1233_p1 = scmp.ge.s32.totalorder %s1369_s30, 2  ;;  %s1121_s25 = sand.u32 1, %s1357_s27  }
 0x2bd   : > { %s1122_s12 = scalar_lea.sflag [#allocation4], %s1121_s25 }
 0x2be   : > { %p1230_p2 = pnand %p1233_p1, %p1477_p6 }
 0x2c0   : > { %1352 = dma.done.wait (!%p1230_p2), %s1122_s12, 128  }
 0x2c1   : > { %1354 = vsyncadd (!%p1230_p2), %s1122_s12, 4294967168  ;;  %p18_p3 = scmp.ge.s32.totalorder %s1460_s11, 4   ;;  %s1953_s27 = smov %s1361_s28 }
 0x2c2   : > { %s1954_s28 = smov %s1365_s29  ;;  %s1955_s29 = smov %s1471_s14 }
 0x2c3   : > { %s1956_s30 = smov %s1460_s11  ;;  %20 = sbr.rel (!%p18_p3) target bundleno = 3 (0x3), region = 87 }
 0x2ca   :  { %1127 = vsyncpa [#allocation4], 1 }
 0x2cb   :  { %1129 = vsyncpa [#allocation4 + $0x1], 1 }

</bundles_post_ra>
